<compile_context>
chip_gen: v5e
topology: v5e:2x2
jax: 0.10.0
libtpu: 0.0.40
codegen_flags: <defaults>
</compile_context>

<pallas_src>
import functools

import jax
import jax.numpy as jnp
import numpy as np
from jax.experimental import pallas as pl
from jax.experimental.pallas import tpu as pltpu

_TILE_B = 16       # images per grid step (bf16 sublane packing = 16 rows/vreg)
_HEAD_PAD = 128    # fused policy+value head padded to one full lane vector

# Geometry implied by the module spec (16x16 obs, two k=4/s=2/p=1 convs).
_IN_HW = 16
_KH = 4
_OH1 = 8           # conv1 output spatial (8x8)
_C1 = 8            # conv1 filters
_OH2 = 4           # conv2 output spatial (4x4)
_C2 = 16           # conv2 filters


# ----------------------------------------------------------------------------
# Pallas kernel: whole vision net for one 16-image batch tile, one launch
# ----------------------------------------------------------------------------
def _fused_vision_net_kernel(p_ref, w1_ref, m2_ref, wh_ref, b_ref, o_ref):
    # conv1: one GEMM over (spatial-row, image) x im2col patches.
    # p_ref: [8*16, 512] bf16, w1_ref: [512, 64] bf16 (block-diag over ow).
    h1 = jnp.dot(p_ref[...], w1_ref[...], preferred_element_type=jnp.float32)
    h1 = jnp.maximum(h1 + b_ref[0:1, 0:_OH1 * _C1], 0.0).astype(jnp.bfloat16)

    # conv2: 8 accumulating GEMMs, one per input spatial row.  Each LHS slice
    # is a whole bf16 vreg group (rows r*16:(r+1)*16) -> no relayout.
    row = _OH1 * _C1                                   # 64 = (w, cin) per input row
    acc = jnp.dot(h1[0:_TILE_B, :], m2_ref[0:row, :],
                  preferred_element_type=jnp.float32)  # [16, 256]
    for r in range(1, _OH1):
        acc = acc + jnp.dot(h1[r * _TILE_B:(r + 1) * _TILE_B, :],
                            m2_ref[r * row:(r + 1) * row, :],
                            preferred_element_type=jnp.float32)
    h2 = jnp.maximum(acc + b_ref[1:2, :], 0.0).astype(jnp.bfloat16)   # [16, 256]

    # fused policy-logits + value head.
    o_ref[...] = (jnp.dot(h2, wh_ref[...], preferred_element_type=jnp.float32)
                  + b_ref[2:3, 0:_HEAD_PAD])


# ----------------------------------------------------------------------------
# Init-time weight preparation (runs once; not on the hot forward path)
# ----------------------------------------------------------------------------
def _unrolled_conv_matrix(w, in_hw, stride, pad):
    """Dense matrix for a Conv2d acting on NHWC-flattened feature maps."""
    Cout, Cin, kh, kw = w.shape
    H = W = in_hw
    OH = (H + 2 * pad - kh) // stride + 1
    OW = (W + 2 * pad - kw) // stride + 1
    w_np = np.asarray(w, np.float32)
    M = np.zeros((H * W * Cin, OH * OW * Cout), np.float32)
    for oh in range(OH):
        for ow in range(OW):
            col0 = (oh * OW + ow) * Cout
            for i in range(kh):
                h = stride * oh + i - pad
                if not 0 <= h < H:
                    continue
                for j in range(kw):
                    ww = stride * ow + j - pad
                    if not 0 <= ww < W:
                        continue
                    row0 = (h * W + ww) * Cin
                    M[row0:row0 + Cin, col0:col0 + Cout] += w_np[:, :, i, j].T
    return M, OH, OW


def _remap_head(w, C, H, W):
    """PyTorch head weight [out, C*H*W] (NCHW flatten) -> [H*W*C, out] (NHWC)."""
    out = w.shape[0]
    return (np.asarray(w, np.float32)
            .reshape(out, C, H, W)
            .transpose(2, 3, 1, 0)
            .reshape(H * W * C, out))


def prepare_params(params, num_outputs):
    """Pre-transform PyTorch-layout parameters into kernel-ready tensors."""
    assert num_outputs + 1 <= _HEAD_PAD, "fused head (logits+value) overflows 128 lanes"

    w1 = np.asarray(params["w1"], np.float32)              # [C1, Cin, 4, 4]
    C1, Cin, kh, kw = w1.shape
    assert C1 == _C1 and kh == _KH and kw == _KH

    # conv1 im2col weight for ONE output position: rows (ki, kj, cin) -> cols cout.
    blk = w1.transpose(2, 3, 1, 0).reshape(kh * kw * Cin, C1)        # [64, 8]
    # Block-diagonal over the 8 output columns of one spatial row, so the GEMM
    # output is already laid out as (ow, cout) -> no in-kernel reshape.
    pf = kh * kw * Cin                                                # 64
    W1bd = np.zeros((_OH1 * pf, _OH1 * C1), np.float32)               # [512, 64]
    for ow in range(_OH1):
        W1bd[ow * pf:(ow + 1) * pf, ow * C1:(ow + 1) * C1] = blk

    # conv2 dense unrolled matrix (rows = (h, w, cin) of the 8x8x8 map,
    # cols = (oh, ow, cout) of the 4x4x16 map).
    M2, OH2, OW2 = _unrolled_conv_matrix(params["w2"], _OH1, 2, 1)    # [512, 256]
    C2 = params["w2"].shape[0]
    assert C2 == _C2 and OH2 == _OH2 and OW2 == _OH2

    # Fused policy + value head, zero-padded to a full lane vector.
    w3 = _remap_head(params["w3"], C2, OH2, OW2)                      # [256, num_outputs]
    w4 = _remap_head(params["w4"], C2, OH2, OW2)                      # [256, 1]
    wh = np.zeros((M2.shape[1], _HEAD_PAD), np.float32)
    wh[:, :num_outputs] = w3
    wh[:, num_outputs:num_outputs + 1] = w4

    # All three biases in one operand: row0 conv1 (tiled per ow), row1 conv2
    # (tiled per output position), row2 fused head.
    nb2 = OH2 * OW2 * C2                                              # 256
    biases = np.zeros((3, nb2), np.float32)
    biases[0, :_OH1 * C1] = np.tile(np.asarray(params["b1"], np.float32), _OH1)
    biases[1, :] = np.tile(np.asarray(params["b2"], np.float32), OH2 * OW2)
    biases[2, :num_outputs] = np.asarray(params["b3"], np.float32)
    biases[2, num_outputs] = float(np.asarray(params["b4"], np.float32)[0])

    return {
        "w1": jnp.asarray(W1bd, jnp.bfloat16),     # 64 KB
        "m2": jnp.asarray(M2, jnp.bfloat16),       # 256 KB
        "wh": jnp.asarray(wh, jnp.bfloat16),       # 64 KB
        "bias": jnp.asarray(biases, jnp.float32),  # 3 KB
    }


# ----------------------------------------------------------------------------
# Wrapper-side im2col for conv1 (tiny; pure XLA glue)
# ----------------------------------------------------------------------------
def _im2col_conv1(x):
    """x: [Bp, 16, 16, Cin] f32, Bp multiple of 16.

    Returns [nt * 8 * 16, 8 * 16 * Cin] bf16 patches with rows ordered
    (batch_tile, spatial_row r, image b) and cols ordered (ow, ki, kj, cin).
    """
    Bp, H, W, Cin = x.shape
    nt = Bp // _TILE_B
    xp = jnp.pad(x, ((0, 0), (1, 1), (1, 1), (0, 0)))                  # [Bp, 18, 18, Cin]
    slabs = [xp[:, ki:ki + 2 * _OH1:2, kj:kj + 2 * _OH1:2, :]          # [Bp, 8, 8, Cin]
             for ki in range(_KH) for kj in range(_KH)]
    g = jnp.stack(slabs, axis=3)                                       # [Bp, r, ow, kk, cin]
    g = g.reshape(nt, _TILE_B, _OH1, _OH1, _KH * _KH, Cin)
    p = jnp.transpose(g, (0, 2, 1, 3, 4, 5))                           # (nt, r, b, ow, kk, cin)
    p = p.reshape(nt * _OH1 * _TILE_B, _OH1 * _KH * _KH * Cin)
    return p.astype(jnp.bfloat16)


# ----------------------------------------------------------------------------
# Forward (mirrors TorchCustomModel_3.forward + value_function)
# ----------------------------------------------------------------------------
def torch_custom_model_3_forward(prepped, obs_nhwc, *, num_outputs):
    B, H, W, C = obs_nhwc.shape
    assert H == _IN_HW and W == _IN_HW
    Bp = -(-B // _TILE_B) * _TILE_B                      # round up to 16 (handles any B)
    nt = Bp // _TILE_B

    x = jnp.pad(obs_nhwc.astype(jnp.float32), ((0, Bp - B), (0, 0), (0, 0), (0, 0)))
    patches = _im2col_conv1(x)                           # [nt*128, 512] bf16
    pcols = patches.shape[1]

    out = pl.pallas_call(
        _fused_vision_net_kernel,
        grid=(nt,),
        in_specs=[
            # per-tile im2col patches
            pl.BlockSpec((_OH1 * _TILE_B, pcols), lambda i: (i, 0)),
            # weights: constant index_map -> DMA'd once, VMEM-resident across the batch grid
            pl.BlockSpec(prepped["w1"].shape, lambda i: (0, 0)),
            pl.BlockSpec(prepped["m2"].shape, lambda i: (0, 0)),
            pl.BlockSpec(prepped["wh"].shape, lambda i: (0, 0)),
            pl.BlockSpec(prepped["bias"].shape, lambda i: (0, 0)),
        ],
        out_specs=pl.BlockSpec((_TILE_B, _HEAD_PAD), lambda i: (i, 0)),
        out_shape=jax.ShapeDtypeStruct((Bp, _HEAD_PAD), jnp.float32),
        compiler_params=pltpu.CompilerParams(
            dimension_semantics=("parallel",),           # megacore-shards batch tiles on v7x
        ),
    )(patches, prepped["w1"], prepped["m2"], prepped["wh"], prepped["bias"])

    logits = out[:B, :num_outputs]                       # fc_out
    value = out[:B, num_outputs]                         # value_function(), reshape([-1])
    return logits, [], value.reshape(-1)


# ----------------------------------------------------------------------------
# PyTorch-layout parameter init (what the nn.Module would hold)
# ----------------------------------------------------------------------------
def init_params(key, in_channels=4, num_outputs=6):
    ks = jax.random.split(key, 8)
    s = 0.05
    return {
        "w1": s * jax.random.normal(ks[0], (_C1, in_channels, _KH, _KH), jnp.float32),
        "b1": s * jax.random.normal(ks[1], (_C1,), jnp.float32),
        "w2": s * jax.random.normal(ks[2], (_C2, _C1, _KH, _KH), jnp.float32),
        "b2": s * jax.random.normal(ks[3], (_C2,), jnp.float32),
        "w3": s * jax.random.normal(ks[4], (num_outputs, _C2 * _OH2 * _OH2), jnp.float32),
        "b3": s * jax.random.normal(ks[5], (num_outputs,), jnp.float32),
        "w4": s * jax.random.normal(ks[6], (1, _C2 * _OH2 * _OH2), jnp.float32),
        "b4": s * jax.random.normal(ks[7], (1,), jnp.float32),
    }


# ----------------------------------------------------------------------------
# Pure-JAX reference (PyTorch NCHW semantics) for the correctness check
# ----------------------------------------------------------------------------
def _conv_ref(x, w, b, stride, pad):
    y = jax.lax.conv_general_dilated(
        x, w, (stride, stride), [(pad, pad), (pad, pad)],
        dimension_numbers=("NCHW", "OIHW", "NCHW"))
    return y + b[None, :, None, None]


def reference_forward(params, obs_nhwc):
    x = jnp.transpose(obs_nhwc.astype(jnp.float32), (0, 3, 1, 2))
    x = jax.nn.relu(_conv_ref(x, params["w1"], params["b1"], 2, 1))
    x = jax.nn.relu(_conv_ref(x, params["w2"], params["b2"], 2, 1))
    flat = x.reshape(x.shape[0], -1)                     # NCHW flatten (PyTorch order)
    logits = flat @ params["w3"].T + params["b3"]
    value = flat @ params["w4"].T + params["b4"]
    return logits, value.reshape(-1)


if __name__ == "__main__":
    key = jax.random.PRNGKey(0)
    k_obs, k_par = jax.random.split(key)

    B, H, W, C = 2, 16, 16, 4
    num_outputs = 6
    obs = jax.random.normal(k_obs, (B, H, W, C), jnp.float32)   # NHWC observation
    params = init_params(k_par, in_channels=C, num_outputs=num_outputs)
    prepped = prepare_params(params, num_outputs)               # once, at init

    fwd = jax.jit(functools.partial(torch_custom_model_3_forward,
                                    num_outputs=num_outputs))

    fc_out, state, value = fwd(prepped, obs)
    fc_out = jax.block_until_ready(fc_out)
    value = jax.block_until_ready(value)

    assert fc_out.shape == (B, num_outputs), fc_out.shape
    assert value.shape == (B,), value.shape
    assert state == []

    ref_logits, ref_value = reference_forward(params, obs)
    np.testing.assert_allclose(np.asarray(fc_out), np.asarray(ref_logits),
                               rtol=5e-2, atol=5e-2)
    np.testing.assert_allclose(np.asarray(value), np.asarray(ref_value),
                               rtol=5e-2, atol=5e-2)

    print("KERNEL_OK")
</pallas_src>

<mosaic_0001>
module attributes {stable_mosaic.version = 11 : i64} {
  func.func @_fused_vision_net_kernel(%arg0: i32, %arg1: memref<128x512xbf16, #tpu.memory_space<vmem>>, %arg2: memref<512x64xbf16, #tpu.memory_space<vmem>>, %arg3: memref<512x256xbf16, #tpu.memory_space<vmem>>, %arg4: memref<256x128xbf16, #tpu.memory_space<vmem>>, %arg5: memref<3x256xf32, #tpu.memory_space<vmem>>, %arg6: memref<16x128xf32, #tpu.memory_space<vmem>>) attributes {dimension_semantics = [#tpu.dimension_semantics<parallel>], iteration_bounds = array<i64: 1>, scalar_prefetch = 0 : i64, scratch_operands = 0 : i64, tpu.core_type = #tpu.core_type<tc>, window_params = [{transform_indices = @transform_0, window_bounds = array<i64: 128, 512>}, {pipeline_mode = #tpu.pipeline_mode<synchronous>, transform_indices = @transform_1, window_bounds = array<i64: 512, 64>}, {pipeline_mode = #tpu.pipeline_mode<synchronous>, transform_indices = @transform_2, window_bounds = array<i64: 512, 256>}, {pipeline_mode = #tpu.pipeline_mode<synchronous>, transform_indices = @transform_3, window_bounds = array<i64: 256, 128>}, {pipeline_mode = #tpu.pipeline_mode<synchronous>, transform_indices = @transform_4, window_bounds = array<i64: 3, 256>}, {transform_indices = @transform_5, window_bounds = array<i64: 16, 128>}]} {
    %c0 = arith.constant 0 : index
    %c0_0 = arith.constant 0 : index
    %0 = vector.load %arg1[%c0, %c0_0] : memref<128x512xbf16, #tpu.memory_space<vmem>>, vector<128x512xbf16>
    %c0_1 = arith.constant 0 : index
    %c0_2 = arith.constant 0 : index
    %1 = vector.load %arg2[%c0_1, %c0_2] : memref<512x64xbf16, #tpu.memory_space<vmem>>, vector<512x64xbf16>
    %cst = arith.constant dense<0.000000e+00> : vector<128x64xf32>
    %2 = tpu.matmul %0, %1, %cst {dimension_numbers = #tpu.dot_dimension_numbers<[1], [0], [0], [1], [0, 0, 1, 1], [], []>} : vector<128x512xbf16>, vector<512x64xbf16>, vector<128x64xf32> -> vector<128x64xf32>
    %c0_3 = arith.constant 0 : index
    %c0_4 = arith.constant 0 : index
    %3 = vector.load %arg5[%c0_3, %c0_4] : memref<3x256xf32, #tpu.memory_space<vmem>>, vector<1x64xf32>
    %4 = vector.broadcast %3 : vector<1x64xf32> to vector<128x64xf32>
    %5 = arith.addf %2, %4 : vector<128x64xf32>
    %cst_5 = arith.constant 0.000000e+00 : f32
    %6 = vector.broadcast %cst_5 : f32 to vector<128x64xf32>
    %7 = arith.maximumf %5, %6 : vector<128x64xf32>
    %8 = arith.truncf %7 : vector<128x64xf32> to vector<128x64xbf16>
    %9 = vector.extract_strided_slice %8 {offsets = [0, 0], sizes = [16, 64], strides = [1, 1]} : vector<128x64xbf16> to vector<16x64xbf16>
    %c0_6 = arith.constant 0 : index
    %c0_7 = arith.constant 0 : index
    %10 = vector.load %arg3[%c0_6, %c0_7] : memref<512x256xbf16, #tpu.memory_space<vmem>>, vector<64x256xbf16>
    %cst_8 = arith.constant dense<0.000000e+00> : vector<16x256xf32>
    %11 = tpu.matmul %9, %10, %cst_8 {dimension_numbers = #tpu.dot_dimension_numbers<[1], [0], [0], [1], [0, 0, 1, 1], [], []>} : vector<16x64xbf16>, vector<64x256xbf16>, vector<16x256xf32> -> vector<16x256xf32>
    %12 = vector.extract_strided_slice %8 {offsets = [16, 0], sizes = [16, 64], strides = [1, 1]} : vector<128x64xbf16> to vector<16x64xbf16>
    %c64 = arith.constant 64 : index
    %c0_9 = arith.constant 0 : index
    %13 = vector.load %arg3[%c64, %c0_9] : memref<512x256xbf16, #tpu.memory_space<vmem>>, vector<64x256xbf16>
    %cst_10 = arith.constant dense<0.000000e+00> : vector<16x256xf32>
    %14 = tpu.matmul %12, %13, %cst_10 {dimension_numbers = #tpu.dot_dimension_numbers<[1], [0], [0], [1], [0, 0, 1, 1], [], []>} : vector<16x64xbf16>, vector<64x256xbf16>, vector<16x256xf32> -> vector<16x256xf32>
    %15 = arith.addf %11, %14 : vector<16x256xf32>
    %16 = vector.extract_strided_slice %8 {offsets = [32, 0], sizes = [16, 64], strides = [1, 1]} : vector<128x64xbf16> to vector<16x64xbf16>
    %c128 = arith.constant 128 : index
    %c0_11 = arith.constant 0 : index
    %17 = vector.load %arg3[%c128, %c0_11] : memref<512x256xbf16, #tpu.memory_space<vmem>>, vector<64x256xbf16>
    %cst_12 = arith.constant dense<0.000000e+00> : vector<16x256xf32>
    %18 = tpu.matmul %16, %17, %cst_12 {dimension_numbers = #tpu.dot_dimension_numbers<[1], [0], [0], [1], [0, 0, 1, 1], [], []>} : vector<16x64xbf16>, vector<64x256xbf16>, vector<16x256xf32> -> vector<16x256xf32>
    %19 = arith.addf %15, %18 : vector<16x256xf32>
    %20 = vector.extract_strided_slice %8 {offsets = [48, 0], sizes = [16, 64], strides = [1, 1]} : vector<128x64xbf16> to vector<16x64xbf16>
    %c192 = arith.constant 192 : index
    %c0_13 = arith.constant 0 : index
    %21 = vector.load %arg3[%c192, %c0_13] : memref<512x256xbf16, #tpu.memory_space<vmem>>, vector<64x256xbf16>
    %cst_14 = arith.constant dense<0.000000e+00> : vector<16x256xf32>
    %22 = tpu.matmul %20, %21, %cst_14 {dimension_numbers = #tpu.dot_dimension_numbers<[1], [0], [0], [1], [0, 0, 1, 1], [], []>} : vector<16x64xbf16>, vector<64x256xbf16>, vector<16x256xf32> -> vector<16x256xf32>
    %23 = arith.addf %19, %22 : vector<16x256xf32>
    %24 = vector.extract_strided_slice %8 {offsets = [64, 0], sizes = [16, 64], strides = [1, 1]} : vector<128x64xbf16> to vector<16x64xbf16>
    %c256 = arith.constant 256 : index
    %c0_15 = arith.constant 0 : index
    %25 = vector.load %arg3[%c256, %c0_15] : memref<512x256xbf16, #tpu.memory_space<vmem>>, vector<64x256xbf16>
    %cst_16 = arith.constant dense<0.000000e+00> : vector<16x256xf32>
    %26 = tpu.matmul %24, %25, %cst_16 {dimension_numbers = #tpu.dot_dimension_numbers<[1], [0], [0], [1], [0, 0, 1, 1], [], []>} : vector<16x64xbf16>, vector<64x256xbf16>, vector<16x256xf32> -> vector<16x256xf32>
    %27 = arith.addf %23, %26 : vector<16x256xf32>
    %28 = vector.extract_strided_slice %8 {offsets = [80, 0], sizes = [16, 64], strides = [1, 1]} : vector<128x64xbf16> to vector<16x64xbf16>
    %c320 = arith.constant 320 : index
    %c0_17 = arith.constant 0 : index
    %29 = vector.load %arg3[%c320, %c0_17] : memref<512x256xbf16, #tpu.memory_space<vmem>>, vector<64x256xbf16>
    %cst_18 = arith.constant dense<0.000000e+00> : vector<16x256xf32>
    %30 = tpu.matmul %28, %29, %cst_18 {dimension_numbers = #tpu.dot_dimension_numbers<[1], [0], [0], [1], [0, 0, 1, 1], [], []>} : vector<16x64xbf16>, vector<64x256xbf16>, vector<16x256xf32> -> vector<16x256xf32>
    %31 = arith.addf %27, %30 : vector<16x256xf32>
    %32 = vector.extract_strided_slice %8 {offsets = [96, 0], sizes = [16, 64], strides = [1, 1]} : vector<128x64xbf16> to vector<16x64xbf16>
    %c384 = arith.constant 384 : index
    %c0_19 = arith.constant 0 : index
    %33 = vector.load %arg3[%c384, %c0_19] : memref<512x256xbf16, #tpu.memory_space<vmem>>, vector<64x256xbf16>
    %cst_20 = arith.constant dense<0.000000e+00> : vector<16x256xf32>
    %34 = tpu.matmul %32, %33, %cst_20 {dimension_numbers = #tpu.dot_dimension_numbers<[1], [0], [0], [1], [0, 0, 1, 1], [], []>} : vector<16x64xbf16>, vector<64x256xbf16>, vector<16x256xf32> -> vector<16x256xf32>
    %35 = arith.addf %31, %34 : vector<16x256xf32>
    %36 = vector.extract_strided_slice %8 {offsets = [112, 0], sizes = [16, 64], strides = [1, 1]} : vector<128x64xbf16> to vector<16x64xbf16>
    %c448 = arith.constant 448 : index
    %c0_21 = arith.constant 0 : index
    %37 = vector.load %arg3[%c448, %c0_21] : memref<512x256xbf16, #tpu.memory_space<vmem>>, vector<64x256xbf16>
    %cst_22 = arith.constant dense<0.000000e+00> : vector<16x256xf32>
    %38 = tpu.matmul %36, %37, %cst_22 {dimension_numbers = #tpu.dot_dimension_numbers<[1], [0], [0], [1], [0, 0, 1, 1], [], []>} : vector<16x64xbf16>, vector<64x256xbf16>, vector<16x256xf32> -> vector<16x256xf32>
    %39 = arith.addf %35, %38 : vector<16x256xf32>
    %c1 = arith.constant 1 : index
    %c0_23 = arith.constant 0 : index
    %40 = vector.load %arg5[%c1, %c0_23] : memref<3x256xf32, #tpu.memory_space<vmem>>, vector<1x256xf32>
    %41 = vector.broadcast %40 : vector<1x256xf32> to vector<16x256xf32>
    %42 = arith.addf %39, %41 : vector<16x256xf32>
    %cst_24 = arith.constant 0.000000e+00 : f32
    %43 = vector.broadcast %cst_24 : f32 to vector<16x256xf32>
    %44 = arith.maximumf %42, %43 : vector<16x256xf32>
    %45 = arith.truncf %44 : vector<16x256xf32> to vector<16x256xbf16>
    %c0_25 = arith.constant 0 : index
    %c0_26 = arith.constant 0 : index
    %46 = vector.load %arg4[%c0_25, %c0_26] : memref<256x128xbf16, #tpu.memory_space<vmem>>, vector<256x128xbf16>
    %cst_27 = arith.constant dense<0.000000e+00> : vector<16x128xf32>
    %47 = tpu.matmul %45, %46, %cst_27 {dimension_numbers = #tpu.dot_dimension_numbers<[1], [0], [0], [1], [0, 0, 1, 1], [], []>} : vector<16x256xbf16>, vector<256x128xbf16>, vector<16x128xf32> -> vector<16x128xf32>
    %c2 = arith.constant 2 : index
    %c0_28 = arith.constant 0 : index
    %48 = vector.load %arg5[%c2, %c0_28] : memref<3x256xf32, #tpu.memory_space<vmem>>, vector<1x128xf32>
    %49 = vector.broadcast %48 : vector<1x128xf32> to vector<16x128xf32>
    %50 = arith.addf %47, %49 : vector<16x128xf32>
    %c0_29 = arith.constant 0 : index
    %c0_30 = arith.constant 0 : index
    %51 = vector.load %arg6[%c0_29, %c0_30] : memref<16x128xf32, #tpu.memory_space<vmem>>, vector<16x128xf32>
    tpu.vector_store %arg6[%c0_29, %c0_30], %50 {strides = array<i32>} : memref<16x128xf32, #tpu.memory_space<vmem>>, vector<16x128xf32>,
    return
  }
  func.func @transform_0(%arg0: i32) -> (i32, i32) {
    %c0_i32 = arith.constant 0 : i32
    %c0_i32_0 = arith.constant 0 : i32
    return %arg0, %c0_i32 : i32, i32
  }
  func.func @transform_1(%arg0: i32) -> (i32, i32) {
    %c0_i32 = arith.constant 0 : i32
    %c0_i32_0 = arith.constant 0 : i32
    %c0_i32_1 = arith.constant 0 : i32
    return %c0_i32, %c0_i32_0 : i32, i32
  }
  func.func @transform_2(%arg0: i32) -> (i32, i32) {
    %c0_i32 = arith.constant 0 : i32
    %c0_i32_0 = arith.constant 0 : i32
    %c0_i32_1 = arith.constant 0 : i32
    return %c0_i32, %c0_i32_0 : i32, i32
  }
  func.func @transform_3(%arg0: i32) -> (i32, i32) {
    %c0_i32 = arith.constant 0 : i32
    %c0_i32_0 = arith.constant 0 : i32
    %c0_i32_1 = arith.constant 0 : i32
    return %c0_i32, %c0_i32_0 : i32, i32
  }
  func.func @transform_4(%arg0: i32) -> (i32, i32) {
    %c0_i32 = arith.constant 0 : i32
    %c0_i32_0 = arith.constant 0 : i32
    %c0_i32_1 = arith.constant 0 : i32
    return %c0_i32, %c0_i32_0 : i32, i32
  }
  func.func @transform_5(%arg0: i32) -> (i32, i32) {
    %c0_i32 = arith.constant 0 : i32
    %c0_i32_0 = arith.constant 0 : i32
    return %arg0, %c0_i32 : i32, i32
  }
}

</mosaic_0001>

<bundles_post_ra>
// kernel: torch_custom_model_3_forward.1
= control target key start
LH: loop header
LB: loop body
LE: loop exit
PB: predicated region body
PF: predicated region fallthrough
CT: control target
= control target key end

     0   :  { %vm760_vm0 = vcmask 523264   ;;  %s3139_s1 = inlined_call_operand.vmem [shape: bf16[512,64], index: 1, kind: input, shape index: {}]   ;;  %s3140_s4 = inlined_call_operand.vmem [shape: f32[3,256], index: 4, kind: input, shape index: {}]   ;;  %s3141_s0 = inlined_call_operand.vmem [shape: bf16[128,512], index: 0, kind: input, shape index: {}]   ;;  %s3142_s2 = inlined_call_operand.vmem [shape: bf16[512,256], index: 2, kind: input, shape index: {}]   ;;  %s3143_s3 = inlined_call_operand.vmem [shape: bf16[256,128], index: 3, kind: input, shape index: {}]   ;;  %s3144_s5 = inlined_call_operand.vmem [shape: f32[16,128], index: 5, kind: output, shape index: {}]  }
   0x1   :  { %v2209_v0 = vld [vmem:[%s3139_s1 + $0x38] sm:$0xff]  ;;  %v2208_v4 = vld [vmem:[%s3139_s1 + $0x30] sm:$0xff]  ;;  %v2207_v8 = vld [vmem:[%s3139_s1 + $0x28] sm:$0xff] }
   0x2   :  { %v2217_v1 = vld [vmem:[%s3139_s1 + $0x78] sm:$0xff]  ;;  %471 = vmatpush.bf16.msra.mxu0 %v2209_v0  ;;  %v2216_v5 = vld [vmem:[%s3139_s1 + $0x70] sm:$0xff]  ;;  %v2215_v9 = vld [vmem:[%s3139_s1 + $0x68] sm:$0xff] }
   0x3   :  { %v2225_v2 = vld [vmem:[%s3139_s1 + $0xb8] sm:$0xff]  ;;  %520 = vmatpush.bf16.msra.mxu1 %v2217_v1  ;;  %v2224_v6 = vld [vmem:[%s3139_s1 + $0xb0] sm:$0xff]  ;;  %v2223_v10 = vld [vmem:[%s3139_s1 + $0xa8] sm:$0xff] }
   0x4   :  { %v2233_v3 = vld [vmem:[%s3139_s1 + $0xf8] sm:$0xff]  ;;  %569 = vmatpush.bf16.msra.mxu2 %v2225_v2  ;;  %v2232_v7 = vld [vmem:[%s3139_s1 + $0xf0] sm:$0xff]  ;;  %v2231_v11 = vld [vmem:[%s3139_s1 + $0xe8] sm:$0xff] }
   0x5   :  { %618 = vmatpush.bf16.msra.mxu3 %v2233_v3  ;;  %v2206_v12 = vld [vmem:[%s3139_s1 + $0x20] sm:$0xff]  ;;  %v2205_v16 = vld [vmem:[%s3139_s1 + $0x18] sm:$0xff]  ;;  %v2204_v20 = vld [vmem:[%s3139_s1 + $0x10] sm:$0xff] }
   0x6   :  { %472 = vmatpush.bf16.msra.mxu0 %v2208_v4  ;;  %v2214_v13 = vld [vmem:[%s3139_s1 + $0x60] sm:$0xff]  ;;  %v2213_v17 = vld [vmem:[%s3139_s1 + $0x58] sm:$0xff]  ;;  %v2212_v21 = vld [vmem:[%s3139_s1 + $0x50] sm:$0xff] }
   0x7   :  { %521 = vmatpush.bf16.msra.mxu1 %v2216_v5  ;;  %v2222_v14 = vld [vmem:[%s3139_s1 + $0xa0] sm:$0xff]  ;;  %v2221_v18 = vld [vmem:[%s3139_s1 + $0x98] sm:$0xff]  ;;  %v2220_v22 = vld [vmem:[%s3139_s1 + $0x90] sm:$0xff] }
   0x8   :  { %570 = vmatpush.bf16.msra.mxu2 %v2224_v6  ;;  %v2230_v15 = vld [vmem:[%s3139_s1 + $0xe0] sm:$0xff]  ;;  %v2229_v19 = vld [vmem:[%s3139_s1 + $0xd8] sm:$0xff]  ;;  %v2228_v23 = vld [vmem:[%s3139_s1 + $0xd0] sm:$0xff] }
   0x9   :  { %619 = vmatpush.bf16.msra.mxu3 %v2232_v7  ;;  %v2203_v24 = vld [vmem:[%s3139_s1 + $0x8] sm:$0xff]  ;;  %v2202_v28 = vld [vmem:[%s3139_s1] sm:$0xff]  ;;  %v2172_v33 = vld [vmem:[%s3141_s0 + $0xc] sm:$0xf0] }
   0xa   :  { %473 = vmatpush.bf16.msra.mxu0 %v2207_v8  ;;  %v2211_v25 = vld [vmem:[%s3139_s1 + $0x48] sm:$0xff]  ;;  %v2210_v29 = vld [vmem:[%s3139_s1 + $0x40] sm:$0xff]  ;;  %v1581_v35 = vld [vmem:[%s3141_s0 + $0x10] sm:$0xf0] }
   0xb   :  { %522 = vmatpush.bf16.msra.mxu1 %v2215_v9  ;;  %v2219_v26 = vld [vmem:[%s3139_s1 + $0x88] sm:$0xff]  ;;  %v2218_v30 = vld [vmem:[%s3139_s1 + $0x80] sm:$0xff]  ;;  %v2173_v37 = vld [vmem:[%s3141_s0 + $0x14] sm:$0xf0] }
   0xc   :  { %571 = vmatpush.bf16.msra.mxu2 %v2223_v10  ;;  %v2227_v27 = vld [vmem:[%s3139_s1 + $0xc8] sm:$0xff]  ;;  %v2226_v31 = vld [vmem:[%s3139_s1 + $0xc0] sm:$0xff]  ;;  %v1589_v39 = vld [vmem:[%s3141_s0 + $0x18] sm:$0xf0] }
   0xd   :  { %620 = vmatpush.bf16.msra.mxu3 %v2231_v11  ;;  %v1579_v32 = vld [vmem:[%s3141_s0] sm:$0xf]  ;;  %v2170_v34 = vld [vmem:[%s3141_s0 + $0x4] sm:$0xf]  ;;  %v1587_v36 = vld [vmem:[%s3141_s0 + $0x8] sm:$0xf] }
   0xe   :  { %474 = vmatpush.bf16.msra.mxu0 %v2206_v12  ;;  %v2171_v38 = vld [vmem:[%s3141_s0 + $0xc] sm:$0xf]  ;;  %v1580_v40 = vor.u32 %v2172_v33, %v1579_v32  ;;  %v1584_v41 = vor.u32 %v2170_v34, %v1581_v35  ;;  %v1588_v42 = vor.u32 %v2173_v37, %v1587_v36  ;;  %v1595_v44 = vld [vmem:[%s3141_s0 + $0x20] sm:$0xf]  ;;  %v2176_v45 = vld [vmem:[%s3141_s0 + $0x2c] sm:$0xf0] }
   0xf   :  { %523 = vmatpush.bf16.msra.mxu1 %v2214_v13  ;;  %v1592_v43 = vor.u32 %v2171_v38, %v1589_v39  ;;  %v2174_v46 = vld [vmem:[%s3141_s0 + $0x24] sm:$0xf]  ;;  %v1597_v47 = vld [vmem:[%s3141_s0 + $0x30] sm:$0xf0]  ;;  %v1603_v48 = vld [vmem:[%s3141_s0 + $0x28] sm:$0xf]  ;;  %v1596_v52 = vor.u32 %v2176_v45, %v1595_v44 }
  0x10   :  { %572 = vmatpush.bf16.msra.mxu2 %v2222_v14  ;;  %v2177_v49 = vld [vmem:[%s3141_s0 + $0x34] sm:$0xf0]  ;;  %v2175_v50 = vld [vmem:[%s3141_s0 + $0x2c] sm:$0xf]  ;;  %v1605_v51 = vld [vmem:[%s3141_s0 + $0x38] sm:$0xf0]  ;;  %v1600_v53 = vor.u32 %v2174_v46, %v1597_v47 }
  0x11   :  { %621 = vmatpush.bf16.msra.mxu3 %v2230_v15  ;;  %v1604_v54 = vor.u32 %v2177_v49, %v1603_v48  ;;  %v1608_v55 = vor.u32 %v2175_v50, %v1605_v51  ;;  %v1611_v56 = vld [vmem:[%s3141_s0 + $0x40] sm:$0xf]  ;;  %v2180_v57 = vld [vmem:[%s3141_s0 + $0x4c] sm:$0xf0]  ;;  %v2178_v58 = vld [vmem:[%s3141_s0 + $0x44] sm:$0xf] }
  0x12   :  { %475 = vmatpush.bf16.msra.mxu0 %v2205_v16  ;;  %v1613_v59 = vld [vmem:[%s3141_s0 + $0x50] sm:$0xf0]  ;;  %v1619_v60 = vld [vmem:[%s3141_s0 + $0x48] sm:$0xf]  ;;  %v2181_v61 = vld [vmem:[%s3141_s0 + $0x54] sm:$0xf0]  ;;  %v1612_v0 = vor.u32 %v2180_v57, %v1611_v56 }
  0x13   :  { %524 = vmatpush.bf16.msra.mxu1 %v2213_v17  ;;  %v2179_v62 = vld [vmem:[%s3141_s0 + $0x4c] sm:$0xf]  ;;  %v1621_v63 = vld [vmem:[%s3141_s0 + $0x58] sm:$0xf0]  ;;  %v1616_v1 = vor.u32 %v2178_v58, %v1613_v59  ;;  %v1620_v2 = vor.u32 %v2181_v61, %v1619_v60  ;;  %v1859_v4 = vld [vmem:[%s3142_s2 + $0x70] sm:$0xf] }
  0x14   :  { %573 = vmatpush.bf16.msra.mxu2 %v2221_v18  ;;  %v1624_v3 = vor.u32 %v2179_v62, %v1621_v63  ;;  %v2249_v5 = vld [vmem:[%s3142_s2 + $0x74] sm:$0xf0]  ;;  %v2248_v6 = vld [vmem:[%s3142_s2 + $0x74] sm:$0xf]  ;;  %v1861_v8 = vld [vmem:[%s3142_s2 + $0x78] sm:$0xf0] }
  0x15   :  { %622 = vmatpush.bf16.msra.mxu3 %v2229_v19  ;;  %v1860_v7 = vor.u32 %v2249_v5, %v1859_v4  ;;  %v1864_v9 = vor.u32 %v2248_v6, %v1861_v8  ;;  %v1627_v10 = vld [vmem:[%s3141_s0 + $0x60] sm:$0xf]  ;;  %v2184_v11 = vld [vmem:[%s3141_s0 + $0x6c] sm:$0xf0]  ;;  %v2182_v12 = vld [vmem:[%s3141_s0 + $0x64] sm:$0xf] }
  0x16   :  { %476 = vmatpush.bf16.msra.mxu0 %v2204_v20  ;;  %v1629_v13 = vld [vmem:[%s3141_s0 + $0x70] sm:$0xf0]  ;;  %v1635_v14 = vld [vmem:[%s3141_s0 + $0x68] sm:$0xf]  ;;  %v2185_v15 = vld [vmem:[%s3141_s0 + $0x74] sm:$0xf0]  ;;  %v1628_v18 = vor.u32 %v2184_v11, %v1627_v10 }
  0x17   :  { %525 = vmatpush.bf16.msra.mxu1 %v2212_v21  ;;  %v2183_v16 = vld [vmem:[%s3141_s0 + $0x6c] sm:$0xf]  ;;  %v1637_v17 = vld [vmem:[%s3141_s0 + $0x78] sm:$0xf0]  ;;  %v1632_v19 = vor.u32 %v2182_v12, %v1629_v13  ;;  %v1636_v20 = vor.u32 %v2185_v15, %v1635_v14  ;;  %v1851_v34 = vld [vmem:[%s3142_s2 + $0x60] sm:$0xf] }
  0x18   :  { %574 = vmatpush.bf16.msra.mxu2 %v2220_v22  ;;  %v1640_v21 = vor.u32 %v2183_v16, %v1637_v17  ;;  %v1643_v22 = vld [vmem:[%s3141_s0 + $0x80] sm:$0xf]  ;;  %v2247_v35 = vld [vmem:[%s3142_s2 + $0x64] sm:$0xf0]  ;;  %v2246_v36 = vld [vmem:[%s3142_s2 + $0x64] sm:$0xf] }
  0x19   :  { %623 = vmatpush.bf16.msra.mxu3 %v2228_v23  ;;  %v2188_v23 = vld [vmem:[%s3141_s0 + $0x8c] sm:$0xf0]  ;;  %v1852_v37 = vor.u32 %v2247_v35, %v1851_v34  ;;  %v1853_v38 = vld [vmem:[%s3142_s2 + $0x68] sm:$0xf0]  ;;  %v1929_v44 = vld [vmem:[%s3142_s2 + $0xb8] sm:$0xf0] }
  0x1a   :  { %477 = vmatpush.bf16.msra.mxu0 %v2203_v24  ;;  %v2186_v24 = vld [vmem:[%s3141_s0 + $0x84] sm:$0xf]  ;;  %v1927_v39 = vld [vmem:[%s3142_s2 + $0xb0] sm:$0xf]  ;;  %v1659_v46 = vld [vmem:[%s3141_s0 + $0xa0] sm:$0xf] }
  0x1b   :  { %526 = vmatpush.bf16.msra.mxu1 %v2211_v25  ;;  %v1645_v25 = vld [vmem:[%s3141_s0 + $0x90] sm:$0xf0]  ;;  %v2192_v47 = vld [vmem:[%s3141_s0 + $0xac] sm:$0xf0]  ;;  %v2190_v48 = vld [vmem:[%s3141_s0 + $0xa4] sm:$0xf] }
  0x1c   :  { %575 = vmatpush.bf16.msra.mxu2 %v2219_v26  ;;  %v1651_v26 = vld [vmem:[%s3141_s0 + $0x88] sm:$0xf]  ;;  %v1661_v49 = vld [vmem:[%s3141_s0 + $0xb0] sm:$0xf0]  ;;  %v2193_v51 = vld [vmem:[%s3141_s0 + $0xb4] sm:$0xf0] }
  0x1d   :  { %624 = vmatpush.bf16.msra.mxu3 %v2227_v27  ;;  %v2189_v27 = vld [vmem:[%s3141_s0 + $0x94] sm:$0xf0]  ;;  %v1667_v50 = vld [vmem:[%s3141_s0 + $0xa8] sm:$0xf]  ;;  %v1675_v58 = vld [vmem:[%s3141_s0 + $0xc0] sm:$0xf] }
  0x1e   :  { %478 = vmatpush.bf16.msra.mxu0 %v2202_v28  ;;  %v2187_v28 = vld [vmem:[%s3141_s0 + $0x8c] sm:$0xf]  ;;  %v1652_v32 = vor.u32 %v2189_v27, %v1651_v26  ;;  %v1668_v56 = vor.u32 %v2193_v51, %v1667_v50  ;;  %v2196_v59 = vld [vmem:[%s3141_s0 + $0xcc] sm:$0xf0]  ;;  %v2194_v60 = vld [vmem:[%s3141_s0 + $0xc4] sm:$0xf] }
  0x1f   :  { %527 = vmatpush.bf16.msra.mxu1 %v2210_v29  ;;  %v1653_v29 = vld [vmem:[%s3141_s0 + $0x98] sm:$0xf0]  ;;  %v1677_v61 = vld [vmem:[%s3141_s0 + $0xd0] sm:$0xf0]  ;;  %v1683_v62 = vld [vmem:[%s3141_s0 + $0xc8] sm:$0xf] }
  0x20   :  { %576 = vmatpush.bf16.msra.mxu2 %v2218_v30  ;;  %v1644_v30 = vor.u32 %v2188_v23, %v1643_v22  ;;  %v1656_v33 = vor.u32 %v2187_v28, %v1653_v29  ;;  %v2197_v63 = vld [vmem:[%s3141_s0 + $0xd4] sm:$0xf0]  ;;  %v1691_v6 = vld [vmem:[%s3141_s0 + $0xe0] sm:$0xf]  ;;  %v2198_v8 = vld [vmem:[%s3141_s0 + $0xe4] sm:$0xf] }
  0x21   :  { %625 = vmatpush.bf16.msra.mxu3 %v2226_v31  ;;  %479 = vmatmul.bf16.vlgmr.msra.gmra.mxu0 %v1580_v40  ;;  %v1648_v31 = vor.u32 %v2186_v24, %v1645_v25  ;;  %v2257_v40 = vld [vmem:[%s3142_s2 + $0xb4] sm:$0xf0]  ;;  %v1684_v4 = vor.u32 %v2197_v63, %v1683_v62  ;;  %v1699_v10 = vld [vmem:[%s3141_s0 + $0xe8] sm:$0xf]  ;;  %v2199_v12 = vld [vmem:[%s3141_s0 + $0xec] sm:$0xf] }
  0x22   :  { %528 = vmatmul.bf16.vlgmr.msra.gmra.mxu1 %v1584_v41  ;;  %v1856_v41 = vor.u32 %v2246_v36, %v1853_v38  ;;  %v2201_v11 = vld [vmem:[%s3141_s0 + $0xf4] sm:$0xf0]  ;;  %v1701_v13 = vld [vmem:[%s3141_s0 + $0xf8] sm:$0xf0]  ;;  %v1919_v24 = vld [vmem:[%s3142_s2 + $0xa0] sm:$0xf] }
  0x23   :  { %577 = vmatmul.bf16.vlgmr.msra.gmra.mxu2 %v1588_v42  ;;  %v1928_v42 = vor.u32 %v2257_v40, %v1927_v39  ;;  %v1700_v16 = vor.u32 %v2201_v11, %v1699_v10  ;;  %v1704_v17 = vor.u32 %v2199_v12, %v1701_v13  ;;  %v1845_v22 = vld [vmem:[%s3142_s2 + $0x58] sm:$0xf0]  ;;  %v2255_v25 = vld [vmem:[%s3142_s2 + $0xa4] sm:$0xf0]  ;;  %v2254_v26 = vld [vmem:[%s3142_s2 + $0xa4] sm:$0xf] }
  0x24   :  { %626 = vmatmul.bf16.vlgmr.msra.gmra.mxu3 %v1592_v43  ;;  %768 = vmatpush.bf16.msrb.mxu2 %v1860_v7  ;;  %v2256_v43 = vld [vmem:[%s3142_s2 + $0xb4] sm:$0xf]  ;;  %v2200_v7 = vld [vmem:[%s3141_s0 + $0xec] sm:$0xf0]  ;;  %v1920_v27 = vor.u32 %v2255_v25, %v1919_v24  ;;  %v1921_v28 = vld [vmem:[%s3142_s2 + $0xa8] sm:$0xf0] }
  0x25   :  { %782 = vmatpush.bf16.msrb.mxu3 %v1864_v9  ;;  %v1932_v45 = vor.u32 %v2256_v43, %v1929_v44  ;;  %928 = vmatpush.bf16.msrb.mxu0 %v1928_v42  ;;  %v1693_v9 = vld [vmem:[%s3141_s0 + $0xf0] sm:$0xf0]  ;;  %v1692_v14 = vor.u32 %v2200_v7, %v1691_v6  ;;  %v1924_v29 = vor.u32 %v2254_v26, %v1921_v28  ;;  %v2242_v34 = vld [vmem:[%s3142_s2 + $0x44] sm:$0xf]  ;;  %v1837_v38 = vld [vmem:[%s3142_s2 + $0x48] sm:$0xf0] }
  0x26   :  { %v1696_v15 = vor.u32 %v2198_v8, %v1693_v9  ;;  %v1893_v42 = vld [vmem:[%s3142_s2 + $0x30] sm:$0xf]  ;;  %v2241_v43 = vld [vmem:[%s3142_s2 + $0x34] sm:$0xf0]  ;;  %v2240_v44 = vld [vmem:[%s3142_s2 + $0x34] sm:$0xf] }
  0x27   :  { %942 = vmatpush.bf16.msrb.mxu1 %v1932_v45  ;;  %v1894_v45 = vor.u32 %v2241_v43, %v1893_v42  ;;  %v2238_v50 = vld [vmem:[%s3142_s2 + $0x24] sm:$0xf]  ;;  %v2742_v51 = vld [vmem:[%s3140_s4] ss:$0 sm:$0xff]  ;;  %v2252_v62 = vld [vmem:[%s3142_s2 + $0x94] sm:$0xf] }
  0x28   :  { %769 = vmatpush.bf16.msrb.mxu2 %v1852_v37  ;;  %v2236_v6 = vld [vmem:[%s3142_s2 + $0x14] sm:$0xf]  ;;  %v1879_v7 = vld [vmem:[%s3142_s2 + $0x18] sm:$0xf0]  ;;  %v1869_v9 = vld [vmem:[%s3142_s2] sm:$0xf] }
  0x29   :  { %783 = vmatpush.bf16.msrb.mxu3 %v1856_v41  ;;  %929 = vmatpush.bf16.msrb.mxu0 %v1920_v27  ;;  %v1840_v41 = vor.u32 %v2242_v34, %v1837_v38  ;;  %v1882_v8 = vor.u32 %v2236_v6, %v1879_v7  ;;  %v2235_v10 = vld [vmem:[%s3142_s2 + $0x4] sm:$0xf0]  ;;  %v2234_v11 = vld [vmem:[%s3142_s2 + $0x4] sm:$0xf]  ;;  %v1905_v24 = vld [vmem:[%s3142_s2 + $0x88] sm:$0xf0] }
  0x2a   :  { %v1955_v6 = vld [vmem:[%s3142_s2 + $0xe8] sm:$0xf0]  ;;  %v2272_v7 = vld [vmem:[%s3142_s2 + $0x134] sm:$0xf] }
  0x2b   :  { %943 = vmatpush.bf16.msrb.mxu1 %v1924_v29 }
  0x31   :  { %484 = vmatmul.bf16.gmra.mxu0 %v1596_v52  ;;  %v2191_v52 = vld [vmem:[%s3141_s0 + $0xac] sm:$0xf] }
  0x32   :  { %533 = vmatmul.bf16.gmra.mxu1 %v1600_v53  ;;  %v1669_v53 = vld [vmem:[%s3141_s0 + $0xb8] sm:$0xf0] }
  0x33   :  { %582 = vmatmul.bf16.gmra.mxu2 %v1604_v54  ;;  %v1660_v54 = vor.u32 %v2192_v47, %v1659_v46  ;;  %v1672_v57 = vor.u32 %v2191_v52, %v1669_v53  ;;  %v1895_v46 = vld [vmem:[%s3142_s2 + $0x38] sm:$0xf0] }
  0x34   :  { %631 = vmatmul.bf16.gmra.mxu3 %v1608_v55  ;;  %v1664_v55 = vor.u32 %v2190_v48, %v1661_v49  ;;  %v1898_v47 = vor.u32 %v2240_v44, %v1895_v46  ;;  %v1885_v48 = vld [vmem:[%s3142_s2 + $0x20] sm:$0xf]  ;;  %v2239_v49 = vld [vmem:[%s3142_s2 + $0x24] sm:$0xf0] }
  0x41   :  { %489 = vmatmul.bf16.gmra.mxu0 %v1612_v0  ;;  %v2195_v0 = vld [vmem:[%s3141_s0 + $0xcc] sm:$0xf] }
  0x42   :  { %538 = vmatmul.bf16.gmra.mxu1 %v1616_v1  ;;  %v1685_v1 = vld [vmem:[%s3141_s0 + $0xd8] sm:$0xf0] }
  0x43   :  { %587 = vmatmul.bf16.gmra.mxu2 %v1620_v2  ;;  %v1676_v2 = vor.u32 %v2196_v59, %v1675_v58  ;;  %v1688_v5 = vor.u32 %v2195_v0, %v1685_v1  ;;  %v1913_v0 = vld [vmem:[%s3142_s2 + $0x98] sm:$0xf0]  ;;  %v1877_v1 = vld [vmem:[%s3142_s2 + $0x10] sm:$0xf] }
  0x44   :  { %636 = vmatmul.bf16.gmra.mxu3 %v1624_v3  ;;  %v1680_v3 = vor.u32 %v2194_v60, %v1677_v61  ;;  %v1911_v60 = vld [vmem:[%s3142_s2 + $0x90] sm:$0xf]  ;;  %v2253_v61 = vld [vmem:[%s3142_s2 + $0x94] sm:$0xf0] }
  0x45   :  { %v1912_v63 = vor.u32 %v2253_v61, %v1911_v60 }
  0x47   :  { %930 = vmatpush.bf16.msrb.mxu0 %v1912_v63  ;;  %v1953_v63 = vld [vmem:[%s3142_s2 + $0xe0] sm:$0xf] }
  0x51   :  { %494 = vmatmul.bf16.gmra.mxu0 %v1628_v18  ;;  %v1843_v18 = vld [vmem:[%s3142_s2 + $0x50] sm:$0xf] }
  0x52   :  { %543 = vmatmul.bf16.gmra.mxu1 %v1632_v19  ;;  %v2245_v19 = vld [vmem:[%s3142_s2 + $0x54] sm:$0xf0] }
  0x53   :  { %592 = vmatmul.bf16.gmra.mxu2 %v1636_v20  ;;  %v2244_v20 = vld [vmem:[%s3142_s2 + $0x54] sm:$0xf] }
  0x54   :  { %641 = vmatmul.bf16.gmra.mxu3 %v1640_v21  ;;  %v1844_v21 = vor.u32 %v2245_v19, %v1843_v18  ;;  %v1848_v23 = vor.u32 %v2244_v20, %v1845_v22 }
  0x56   :  { %770 = vmatpush.bf16.msrb.mxu2 %v1844_v21  ;;  %784 = vmatpush.bf16.msrb.mxu3 %v1848_v23  ;;  %v2250_v23 = vld [vmem:[%s3142_s2 + $0x84] sm:$0xf] }
  0x57   :  { %v1908_v25 = vor.u32 %v2250_v23, %v1905_v24  ;;  %v1987_v23 = vld [vmem:[%s3142_s2 + $0x120] sm:$0xf]  ;;  %v2271_v24 = vld [vmem:[%s3142_s2 + $0x124] sm:$0xf0] }
  0x5a   :  { %785 = vmatpush.bf16.msrb.mxu3 %v1840_v41 }
  0x5e   :  { %858 = vmatpush.bf16.msra.mxu3 %v1898_v47 }
  0x61   :  { %499 = vmatmul.bf16.gmra.mxu0 %v1644_v30 }
  0x62   :  { %548 = vmatmul.bf16.gmra.mxu1 %v1648_v31 }
  0x63   :  { %597 = vmatmul.bf16.gmra.mxu2 %v1652_v32  ;;  %v1835_v32 = vld [vmem:[%s3142_s2 + $0x40] sm:$0xf] }
  0x64   :  { %646 = vmatmul.bf16.gmra.mxu3 %v1656_v33  ;;  %v2243_v33 = vld [vmem:[%s3142_s2 + $0x44] sm:$0xf0] }
  0x65   :  { %v1836_v37 = vor.u32 %v2243_v33, %v1835_v32 }
  0x67   :  { %771 = vmatpush.bf16.msrb.mxu2 %v1836_v37 }
  0x6b   :  { %844 = vmatpush.bf16.msra.mxu2 %v1894_v45 }
  0x71   :  { %504 = vmatmul.bf16.gmra.mxu0 %v1660_v54  ;;  %v1886_v54 = vor.u32 %v2239_v49, %v1885_v48  ;;  %v1961_v49 = vld [vmem:[%s3142_s2 + $0xf0] sm:$0xf] }
  0x72   :  { %553 = vmatmul.bf16.gmra.mxu1 %v1664_v55  ;;  %v1887_v55 = vld [vmem:[%s3142_s2 + $0x28] sm:$0xf0] }
  0x73   :  { %602 = vmatmul.bf16.gmra.mxu2 %v1668_v56  ;;  %v1890_v58 = vor.u32 %v2238_v50, %v1887_v55  ;;  %v2265_v55 = vld [vmem:[%s3142_s2 + $0xf4] sm:$0xf0] }
  0x74   :  { %651 = vmatmul.bf16.gmra.mxu3 %v1672_v57  ;;  %845 = vmatpush.bf16.msra.mxu2 %v1886_v54  ;;  %v1962_v61 = vor.u32 %v2265_v55, %v1961_v49  ;;  %v2269_v49 = vld [vmem:[%s3142_s2 + $0x114] sm:$0xf0] }
  0x75   :  { %859 = vmatpush.bf16.msra.mxu3 %v1890_v58 }
  0x79   :  { %860 = vmatpush.bf16.msra.mxu3 %v1882_v8 }
  0x81   :  { %509 = vmatmul.bf16.gmra.mxu0 %v1676_v2  ;;  %v2237_v2 = vld [vmem:[%s3142_s2 + $0x14] sm:$0xf0] }
  0x82   :  { %558 = vmatmul.bf16.gmra.mxu1 %v1680_v3 }
  0x83   :  { %607 = vmatmul.bf16.gmra.mxu2 %v1684_v4  ;;  %v1916_v4 = vor.u32 %v2252_v62, %v1913_v0 }
  0x84   :  { %656 = vmatmul.bf16.gmra.mxu3 %v1688_v5  ;;  %v1878_v5 = vor.u32 %v2237_v2, %v1877_v1 }
  0x85   :  { %944 = vmatpush.bf16.msrb.mxu1 %v1916_v4  ;;  %v2263_v4 = vld [vmem:[%s3142_s2 + $0xe4] sm:$0xf0] }
  0x86   :  { %846 = vmatpush.bf16.msra.mxu2 %v1878_v5  ;;  %v2262_v5 = vld [vmem:[%s3142_s2 + $0xe4] sm:$0xf] }
  0x89   :  { %945 = vmatpush.bf16.msrb.mxu1 %v1908_v25  ;;  %v2270_v25 = vld [vmem:[%s3142_s2 + $0x124] sm:$0xf] }
  0x91   :  { %514 = vmatmul.bf16.gmra.mxu0 %v1692_v14  ;;  %v1870_v14 = vor.u32 %v2235_v10, %v1869_v9  ;;  %v1997_v10 = vld [vmem:[%s3142_s2 + $0x138] sm:$0xf0] }
  0x92   :  { %563 = vmatmul.bf16.gmra.mxu1 %v1696_v15  ;;  %v1871_v15 = vld [vmem:[%s3142_s2 + $0x8] sm:$0xf0] }
  0x93   :  { %612 = vmatmul.bf16.gmra.mxu2 %v1700_v16  ;;  %v1903_v16 = vld [vmem:[%s3142_s2 + $0x80] sm:$0xf]  ;;  %v1874_v21 = vor.u32 %v2234_v11, %v1871_v15  ;;  %v1954_v11 = vor.u32 %v2263_v4, %v1953_v63  ;;  %v2000_v15 = vor.u32 %v2272_v7, %v1997_v10  ;;  %v2267_v63 = vld [vmem:[%s3142_s2 + $0x104] sm:$0xf0]  ;;  %v2029_v10 = vld [vmem:[%s3142_s2 + $0x170] sm:$0xf] }
  0x94   :  { %661 = vmatmul.bf16.gmra.mxu3 %v1704_v17  ;;  %v2251_v17 = vld [vmem:[%s3142_s2 + $0x84] sm:$0xf0]  ;;  %847 = vmatpush.bf16.msra.mxu2 %v1870_v14  ;;  %v2261_v14 = vld [vmem:[%s3142_s2 + $0xd4] sm:$0xf0] }
  0x95   :  { %v1904_v22 = vor.u32 %v2251_v17, %v1903_v16  ;;  %861 = vmatpush.bf16.msra.mxu3 %v1874_v21  ;;  %1118 = vmatpush.bf16.msra.mxu1 %v2000_v15  ;;  %v2031_v15 = vld [vmem:[%s3142_s2 + $0x178] sm:$0xf0] }
  0x97   :  { %931 = vmatpush.bf16.msrb.mxu0 %v1904_v22 }
  0x9e   :  { %v2694_v30 = vpop.f32.mrf.mxu0 }
  0x9f   :  { %v2696_v31 = vpop.f32.mrf.mxu1  ;;  %v481_v28 = vadd.f32 %v2742_v51, %v2694_v30 }
  0xa1   :  { %v530_v44 = vadd.f32 %v2696_v31, %v481_v28  ;;  %v2264_v31 = vld [vmem:[%s3142_s2 + $0xf4] sm:$0xf] }
  0xa6   :  { %v2707_v35 = vpop.f32.mrf.mxu2  ;;  %v2714_v39 = vpop.f32.mrf.mxu0 }
  0xa7   :  { %v2709_v36 = vpop.f32.mrf.mxu3  ;;  %v2716_v40 = vpop.f32.mrf.mxu1  ;;  %v483_v34 = vadd.f32 %v2742_v51, %v2714_v39  ;;  %v579_v39 = vadd.f32 %v2707_v35, %v530_v44 }
  0xa9   :  { %v532_v46 = vadd.f32 %v2716_v40, %v483_v34  ;;  %v1963_v40 = vld [vmem:[%s3142_s2 + $0xf8] sm:$0xf0]  ;;  %v628_v0 = vadd.f32 %v2709_v36, %v579_v39  ;;  %v1995_v36 = vld [vmem:[%s3142_s2 + $0x130] sm:$0xf]  ;;  %v1989_v34 = vld [vmem:[%s3142_s2 + $0x128] sm:$0xf0] }
  0xaa   :  { %v1966_v62 = vor.u32 %v2264_v31, %v1963_v40  ;;  %v2268_v39 = vld [vmem:[%s3142_s2 + $0x114] sm:$0xf]  ;;  %v1981_v40 = vld [vmem:[%s3142_s2 + $0x118] sm:$0xf0] }
  0xab   :  { %v667_v16 = vmax.f32 %v628_v0, 0.0  ;;  %v2266_v0 = vld [vmem:[%s3142_s2 + $0x104] sm:$0xf] }
  0xae   :  { %v2744_v52 = vpop.f32.mrf.mxu2  ;;  %v485_v56 = vpop.f32.mrf.mxu0 }
  0xaf   :  { %v2746_v53 = vpop.f32.mrf.mxu3  ;;  %v534_v57 = vpop.f32.mrf.mxu1  ;;  %v486_v59 = vadd.f32 %v2742_v51, %v485_v56  ;;  %v581_v50 = vadd.f32 %v2744_v52, %v532_v46  ;;  %v2258_v46 = vld [vmem:[%s3142_s2 + $0xc4] sm:$0xf] }
  0xb1   :  { %v535_v3 = vadd.f32 %v534_v57, %v486_v59  ;;  %v630_v1 = vadd.f32 %v2746_v53, %v581_v50  ;;  %v2273_v53 = vld [vmem:[%s3142_s2 + $0x134] sm:$0xf0] }
  0xb2   :  { %v1996_v9 = vor.u32 %v2273_v53, %v1995_v36  ;;  %v1973_v36 = vld [vmem:[%s3142_s2 + $0x108] sm:$0xf0] }
  0xb3   :  { %v668_v17 = vmax.f32 %v630_v1, 0.0  ;;  %v1976_v53 = vor.u32 %v2266_v0, %v1973_v36  ;;  %v2287_v36 = vld [vmem:[%s3142_s2 + $0x1a4] sm:$0xf0] }
  0xb4   :  { %1104 = vmatpush.bf16.msra.mxu0 %v1996_v9 }
  0xb6   :  { %v583_v12 = vpop.f32.mrf.mxu2  ;;  %v487_v19 = vpop.f32.mrf.mxu0 }
  0xb7   :  { %v632_v13 = vpop.f32.mrf.mxu3  ;;  %v584_v18 = vadd.f32 %v583_v12, %v535_v3  ;;  %v536_v20 = vpop.f32.mrf.mxu1  ;;  %v488_v26 = vadd.f32 %v2742_v51, %v487_v19  ;;  %v1958_v12 = vor.u32 %v2262_v5, %v1955_v6  ;;  %v2260_v19 = vld [vmem:[%s3142_s2 + $0xd4] sm:$0xf] }
  0xb9   :  { %v633_v27 = vadd.f32 %v632_v13, %v584_v18  ;;  %v537_v29 = vadd.f32 %v536_v20, %v488_v26  ;;  %v1945_v13 = vld [vmem:[%s3142_s2 + $0xd0] sm:$0xf]  ;;  %v1947_v20 = vld [vmem:[%s3142_s2 + $0xd8] sm:$0xf0] }
  0xbb   :  { %v669_v37 = vmax.f32 %v633_v27, 0.0 }
  0xbd   :  { %v685_v47 = vpack.c.bf16 %v669_v37, %v669_v37 }
  0xbe   :  { %v585_v32 = vpop.f32.mrf.mxu2  ;;  %v490_v41 = vpop.f32.mrf.mxu0 }
  0xbf   :  { %v634_v33 = vpop.f32.mrf.mxu3  ;;  %v586_v38 = vadd.f32 %v585_v32, %v537_v29  ;;  %v539_v42 = vpop.f32.mrf.mxu1  ;;  %v491_v43 = vadd.f32 %v2742_v51, %v490_v41  ;;  %v717_v58 = vunpack.c.l.b16 %v685_v47  ;;  %v1946_v32 = vor.u32 %v2261_v14, %v1945_v13  ;;  %v1937_v41 = vld [vmem:[%s3142_s2 + $0xc0] sm:$0xf]  ;;  %v1939_v47 = vld [vmem:[%s3142_s2 + $0xc8] sm:$0xf0] }
  0xc1   :  { %v635_v45 = vadd.f32 %v634_v33, %v586_v38  ;;  %v540_v30 = vadd.f32 %v539_v42, %v491_v43  ;;  %v1988_v33 = vor.u32 %v2271_v24, %v1987_v23  ;;  %v1950_v38 = vor.u32 %v2260_v19, %v1947_v20  ;;  %v2021_v20 = vld [vmem:[%s3142_s2 + $0x160] sm:$0xf] }
  0xc2   :  { %v1992_v42 = vor.u32 %v2270_v25, %v1989_v34  ;;  %v684_v43 = vpack.c.bf16 %v668_v17, %v668_v17  ;;  %v2013_v34 = vld [vmem:[%s3142_s2 + $0x150] sm:$0xf] }
  0xc3   :  { %v670_v48 = vmax.f32 %v635_v45, 0.0  ;;  %v2259_v45 = vld [vmem:[%s3142_s2 + $0xc4] sm:$0xf0]  ;;  %1105 = vmatpush.bf16.msra.mxu0 %v1988_v33 }
  0xc4   :  { %1119 = vmatpush.bf16.msra.mxu1 %v1992_v42 }
  0xc5   :  { %v686_v54 = vpack.c.bf16 %v670_v48, %v670_v48  ;;  %v683_v48 = vpack.c.bf16 %v667_v16, %v667_v16 }
  0xc6   :  { %v588_v56 = vpop.f32.mrf.mxu2  ;;  %v492_v60 = vpop.f32.mrf.mxu0 }
  0xc7   :  { %v637_v57 = vpop.f32.mrf.mxu3  ;;  %v718_v59 = vunpack.c.l.b16 %v686_v54  ;;  %v589_v35 = vadd.f32 %v588_v56, %v540_v30  ;;  %v541_v52 = vpop.f32.mrf.mxu1  ;;  %v493_v3 = vadd.f32 %v2742_v51, %v492_v60  ;;  %v1979_v30 = vld [vmem:[%s3142_s2 + $0x110] sm:$0xf]  ;;  %v1938_v56 = vor.u32 %v2259_v45, %v1937_v41  ;;  %v2015_v45 = vld [vmem:[%s3142_s2 + $0x158] sm:$0xf0] }
  0xc8   :  { %v1980_v31 = vor.u32 %v2269_v49, %v1979_v30  ;;  %v794_v60 = vunpack.c.l.b16 %v683_v48  ;;  %v2005_v49 = vld [vmem:[%s3142_s2 + $0x140] sm:$0xf] }
  0xc9   :  { %v719_v2 = vpack.c.b16 %v718_v59, %v717_v58  ;;  %v638_v8 = vadd.f32 %v637_v57, %v589_v35  ;;  %v542_v18 = vadd.f32 %v541_v52, %v493_v3  ;;  %v1942_v57 = vor.u32 %v2258_v46, %v1939_v47 }
  0xca   :  { %v1984_v58 = vor.u32 %v2268_v39, %v1981_v40  ;;  %v795_v59 = vunpack.c.l.b16 %v684_v43  ;;  %1106 = vmatpush.bf16.msra.mxu0 %v1980_v31  ;;  %v2275_v39 = vld [vmem:[%s3142_s2 + $0x144] sm:$0xf0] }
  0xcb   :  { %1865 = vmatmul.msk.bf16.vlgmr.msrb.gmra.mxu2 %vm760_vm0, %v719_v2  ;;  %1866 = vmatmul.msk.bf16.vlgmr.msrb.gmra.mxu3 %vm760_vm0, %v719_v2  ;;  %v671_v26 = vmax.f32 %v638_v8, 0.0 }
  0xcc   :  { %1016 = vmatpush.bf16.msrb.mxu2 %v1962_v61  ;;  %1030 = vmatpush.bf16.msrb.mxu3 %v1966_v62  ;;  %v1971_v62 = vld [vmem:[%s3142_s2 + $0x100] sm:$0xf]  ;;  %v796_v7 = vpack.c.b16 %v795_v59, %v794_v60 }
  0xcd   :  { %v687_v50 = vpack.c.bf16 %v671_v26, %v671_v26  ;;  %1120 = vmatpush.bf16.msra.mxu1 %v1984_v58  ;;  %v1972_v6 = vor.u32 %v2267_v63, %v1971_v62  ;;  %v2007_v58 = vld [vmem:[%s3142_s2 + $0x148] sm:$0xf0]  ;;  %v2288_v62 = vld [vmem:[%s3142_s2 + $0x1b4] sm:$0xf] }
  0xce   :  { %v590_v21 = vpop.f32.mrf.mxu2  ;;  %v495_v28 = vpop.f32.mrf.mxu0 }
  0xcf   :  { %v639_v22 = vpop.f32.mrf.mxu3  ;;  %v591_v27 = vadd.f32 %v590_v21, %v542_v18  ;;  %v544_v29 = vpop.f32.mrf.mxu1  ;;  %v496_v37 = vadd.f32 %v2742_v51, %v495_v28  ;;  %v878_v1 = vunpack.c.l.b16 %v687_v50  ;;  %1107 = vmatpush.bf16.msra.mxu0 %v1972_v6  ;;  %v2279_v21 = vld [vmem:[%s3142_s2 + $0x164] sm:$0xf0]  ;;  %v2023_v28 = vld [vmem:[%s3142_s2 + $0x168] sm:$0xf0]  ;;  %v2274_v50 = vld [vmem:[%s3142_s2 + $0x144] sm:$0xf] }
  0xd0   :  { %1017 = vmatpush.bf16.msrb.mxu2 %v1954_v11  ;;  %1031 = vmatpush.bf16.msrb.mxu3 %v1958_v12  ;;  %v2281_v11 = vld [vmem:[%s3142_s2 + $0x174] sm:$0xf0]  ;;  %v2280_v12 = vld [vmem:[%s3142_s2 + $0x174] sm:$0xf]  ;;  %v2010_v59 = vor.u32 %v2274_v50, %v2007_v58  ;;  %v2055_v6 = vld [vmem:[%s3142_s2 + $0x1a0] sm:$0xf] }
  0xd1   :  { %v640_v44 = vadd.f32 %v639_v22, %v591_v27  ;;  %v545_v55 = vadd.f32 %v544_v29, %v496_v37  ;;  %1121 = vmatpush.bf16.msra.mxu1 %v1976_v53  ;;  %v2030_v14 = vor.u32 %v2281_v11, %v2029_v10  ;;  %v2034_v16 = vor.u32 %v2280_v12, %v2031_v15  ;;  %v2278_v22 = vld [vmem:[%s3142_s2 + $0x164] sm:$0xf]  ;;  %v2277_v37 = vld [vmem:[%s3142_s2 + $0x154] sm:$0xf0]  ;;  %v2057_v12 = vld [vmem:[%s3142_s2 + $0x1a8] sm:$0xf0] }
  0xd2   :  { %v2022_v27 = vor.u32 %v2279_v21, %v2021_v20  ;;  %v2286_v53 = vld [vmem:[%s3142_s2 + $0x1a4] sm:$0xf]  ;;  %v2056_v11 = vor.u32 %v2287_v36, %v2055_v6  ;;  %v2099_v50 = vld [vmem:[%s3142_s2 + $0x1f8] sm:$0xf0] }
  0xd3   :  { %v672_v54 = vmax.f32 %v640_v44, 0.0  ;;  %v2014_v44 = vor.u32 %v2277_v37, %v2013_v34  ;;  %v2294_v58 = vld [vmem:[%s3142_s2 + $0x1e4] sm:$0xf] }
  0xd4   :  { %1018 = vmatpush.bf16.msrb.mxu2 %v1946_v32  ;;  %1032 = vmatpush.bf16.msrb.mxu3 %v1950_v38  ;;  %v2026_v32 = vor.u32 %v2278_v22, %v2023_v28  ;;  %v2276_v38 = vld [vmem:[%s3142_s2 + $0x154] sm:$0xf]  ;;  %v2039_v28 = vld [vmem:[%s3142_s2 + $0x180] sm:$0xf] }
  0xd5   :  { %v688_v35 = vpack.c.bf16 %v672_v54, %v672_v54  ;;  %v2018_v46 = vor.u32 %v2276_v38, %v2015_v45 }
  0xd6   :  { %v593_v52 = vpop.f32.mrf.mxu2  ;;  %v497_v4 = vpop.f32.mrf.mxu0 }
  0xd7   :  { %v642_v61 = vpop.f32.mrf.mxu3  ;;  %v879_v2 = vunpack.c.l.b16 %v688_v35  ;;  %v594_v3 = vadd.f32 %v593_v52, %v545_v55  ;;  %v546_v5 = vpop.f32.mrf.mxu1  ;;  %v498_v9 = vadd.f32 %v2742_v51, %v497_v4  ;;  %v2063_v52 = vld [vmem:[%s3142_s2 + $0x1b0] sm:$0xf] }
  0xd8   :  { %1019 = vmatpush.bf16.msrb.mxu2 %v1938_v56  ;;  %1033 = vmatpush.bf16.msrb.mxu3 %v1942_v57  ;;  %v2006_v57 = vor.u32 %v2275_v39, %v2005_v49 }
  0xd9   :  { %v880_v8 = vpack.c.b16 %v879_v2, %v878_v1  ;;  %v643_v13 = vadd.f32 %v642_v61, %v594_v3  ;;  %v547_v17 = vadd.f32 %v546_v5, %v498_v9  ;;  %v2289_v61 = vld [vmem:[%s3142_s2 + $0x1b4] sm:$0xf0]  ;;  %v2065_v1 = vld [vmem:[%s3142_s2 + $0x1b8] sm:$0xf0] }
  0xda   :  { %v2064_v0 = vor.u32 %v2289_v61, %v2063_v52  ;;  %v2068_v2 = vor.u32 %v2288_v62, %v2065_v1  ;;  %v2091_v62 = vld [vmem:[%s3142_s2 + $0x1e8] sm:$0xf0] }
  0xdb   :  { %1899 = vmatmul.msk.bf16.vlgmr.msra.gmra.mxu2 %vm760_vm0, %v796_v7  ;;  %1900 = vmatmul.msk.bf16.vlgmr.msra.gmra.mxu3 %vm760_vm0, %v796_v7  ;;  %v673_v23 = vmax.f32 %v643_v13, 0.0 }
  0xdc   :  { %1933 = vmatmul.msk.bf16.vlgmr.msrb.gmra.mxu0 %vm760_vm0, %v880_v8  ;;  %1934 = vmatmul.msk.bf16.vlgmr.msrb.gmra.mxu1 %vm760_vm0, %v880_v8 }
  0xdd   :  { %1192 = vmatpush.bf16.msra.mxu2 %v2030_v14  ;;  %1206 = vmatpush.bf16.msra.mxu3 %v2034_v16  ;;  %v689_v41 = vpack.c.bf16 %v673_v23, %v673_v23  ;;  %v2060_v14 = vor.u32 %v2286_v53, %v2057_v12  ;;  %v2047_v16 = vld [vmem:[%s3142_s2 + $0x190] sm:$0xf]  ;;  %v2049_v23 = vld [vmem:[%s3142_s2 + $0x198] sm:$0xf0]  ;;  %v2073_v12 = vld [vmem:[%s3142_s2 + $0x1c0] sm:$0xf] }
  0xde   :  { %v595_v18 = vpop.f32.mrf.mxu2  ;;  %v500_v25 = vpop.f32.mrf.mxu0  ;;  %1280 = vmatpush.bf16.msrb.mxu0 %v2064_v0  ;;  %1294 = vmatpush.bf16.msrb.mxu1 %v2068_v2  ;;  %v2094_v0 = vor.u32 %v2294_v58, %v2091_v62  ;;  %v2081_v2 = vld [vmem:[%s3142_s2 + $0x1d0] sm:$0xf] }
  0xdf   :  { %v644_v19 = vpop.f32.mrf.mxu3  ;;  %v596_v24 = vadd.f32 %v595_v18, %v547_v17  ;;  %v549_v26 = vpop.f32.mrf.mxu1  ;;  %v501_v29 = vadd.f32 %v2742_v51, %v500_v25  ;;  %v966_v54 = vunpack.c.l.b16 %v689_v41  ;;  %v2285_v17 = vld [vmem:[%s3142_s2 + $0x194] sm:$0xf0]  ;;  %v2284_v18 = vld [vmem:[%s3142_s2 + $0x194] sm:$0xf] }
  0xe0   :  { %v2048_v22 = vor.u32 %v2285_v17, %v2047_v16 }
  0xe1   :  { %v645_v33 = vadd.f32 %v644_v19, %v596_v24  ;;  %1193 = vmatpush.bf16.msra.mxu2 %v2022_v27  ;;  %1207 = vmatpush.bf16.msra.mxu3 %v2026_v32  ;;  %v550_v43 = vadd.f32 %v549_v26, %v501_v29  ;;  %v2052_v24 = vor.u32 %v2284_v18, %v2049_v23  ;;  %v2283_v29 = vld [vmem:[%s3142_s2 + $0x184] sm:$0xf0]  ;;  %v2282_v32 = vld [vmem:[%s3142_s2 + $0x184] sm:$0xf] }
  0xe2   :  { %1281 = vmatpush.bf16.msrb.mxu0 %v2056_v11  ;;  %1295 = vmatpush.bf16.msrb.mxu1 %v2060_v14  ;;  %v2290_v14 = vld [vmem:[%s3142_s2 + $0x1c4] sm:$0xf] }
  0xe3   :  { %v674_v42 = vmax.f32 %v645_v33, 0.0 }
  0xe5   :  { %v690_v47 = vpack.c.bf16 %v674_v42, %v674_v42  ;;  %1194 = vmatpush.bf16.msra.mxu2 %v2014_v44  ;;  %1208 = vmatpush.bf16.msra.mxu3 %v2018_v46  ;;  %v2040_v42 = vor.u32 %v2283_v29, %v2039_v28 }
  0xe6   :  { %v598_v48 = vpop.f32.mrf.mxu2  ;;  %v502_v40 = vpop.f32.mrf.mxu0  ;;  %1282 = vmatpush.bf16.msrb.mxu0 %v2048_v22  ;;  %1296 = vmatpush.bf16.msrb.mxu1 %v2052_v24 }
  0xe7   :  { %v647_v30 = vpop.f32.mrf.mxu3  ;;  %v967_v55 = vunpack.c.l.b16 %v690_v47  ;;  %v599_v31 = vadd.f32 %v598_v48, %v550_v43  ;;  %v551_v56 = vpop.f32.mrf.mxu1  ;;  %v503_v60 = vadd.f32 %v2742_v51, %v502_v40  ;;  %v2041_v43 = vld [vmem:[%s3142_s2 + $0x188] sm:$0xf0]  ;;  %v2097_v47 = vld [vmem:[%s3142_s2 + $0x1f0] sm:$0xf]  ;;  %v2297_v48 = vld [vmem:[%s3142_s2 + $0x1f4] sm:$0xf0] }
  0xe8   :  { %v2044_v44 = vor.u32 %v2282_v32, %v2041_v43  ;;  %v2098_v39 = vor.u32 %v2297_v48, %v2097_v47 }
  0xe9   :  { %v968_v35 = vpack.c.b16 %v967_v55, %v966_v54  ;;  %1195 = vmatpush.bf16.msra.mxu2 %v2006_v57  ;;  %1209 = vmatpush.bf16.msra.mxu3 %v2010_v59  ;;  %v648_v63 = vadd.f32 %v647_v30, %v599_v31  ;;  %v552_v3 = vadd.f32 %v551_v56, %v503_v60  ;;  %v2296_v30 = vld [vmem:[%s3142_s2 + $0x1f4] sm:$0xf]  ;;  %v2089_v56 = vld [vmem:[%s3142_s2 + $0x1e0] sm:$0xf]  ;;  %v2295_v57 = vld [vmem:[%s3142_s2 + $0x1e4] sm:$0xf0] }
  0xea   :  { %1283 = vmatpush.bf16.msrb.mxu0 %v2040_v42  ;;  %1297 = vmatpush.bf16.msrb.mxu1 %v2044_v44  ;;  %v2102_v54 = vor.u32 %v2296_v30, %v2099_v50  ;;  %v2090_v61 = vor.u32 %v2295_v57, %v2089_v56 }
  0xeb   :  { %1967 = vmatmul.msk.bf16.vlgmr.msrb.gmra.mxu2 %vm760_vm0, %v968_v35  ;;  %1968 = vmatmul.msk.bf16.vlgmr.msrb.gmra.mxu3 %vm760_vm0, %v968_v35  ;;  %v675_v7 = vmax.f32 %v648_v63, 0.0 }
  0xed   :  { %v691_v19 = vpack.c.bf16 %v675_v7, %v675_v7  ;;  %1368 = vmatpush.bf16.msrb.mxu2 %v2098_v39  ;;  %1382 = vmatpush.bf16.msrb.mxu3 %v2102_v54  ;;  %v2083_v7 = vld [vmem:[%s3142_s2 + $0x1d8] sm:$0xf0] }
  0xee   :  { %v600_v4 = vpop.f32.mrf.mxu2  ;;  %v505_v9 = vpop.f32.mrf.mxu0 }
  0xef   :  { %v649_v5 = vpop.f32.mrf.mxu3  ;;  %v601_v8 = vadd.f32 %v600_v4, %v552_v3  ;;  %v554_v10 = vpop.f32.mrf.mxu1  ;;  %v506_v13 = vadd.f32 %v2742_v51, %v505_v9  ;;  %v1054_v33 = vunpack.c.l.b16 %v691_v19  ;;  %v2293_v3 = vld [vmem:[%s3142_s2 + $0x1d4] sm:$0xf0]  ;;  %v2292_v4 = vld [vmem:[%s3142_s2 + $0x1d4] sm:$0xf] }
  0xf0   :  { %v2082_v53 = vor.u32 %v2293_v3, %v2081_v2 }
  0xf1   :  { %v650_v15 = vadd.f32 %v649_v5, %v601_v8  ;;  %v555_v21 = vadd.f32 %v554_v10, %v506_v13  ;;  %1369 = vmatpush.bf16.msrb.mxu2 %v2090_v61  ;;  %1383 = vmatpush.bf16.msrb.mxu3 %v2094_v0  ;;  %v2086_v8 = vor.u32 %v2292_v4, %v2083_v7  ;;  %v2291_v13 = vld [vmem:[%s3142_s2 + $0x1c4] sm:$0xf0]  ;;  %v2304_v7 = vld [vmem:[%s3143_s3 + $0x30] sm:$0xff] }
  0xf2   :  { %v2074_v19 = vor.u32 %v2291_v13, %v2073_v12  ;;  %v2311_v12 = vld [vmem:[%s3143_s3 + $0x68] sm:$0xff]  ;;  %v2302_v13 = vld [vmem:[%s3143_s3 + $0x20] sm:$0xff] }
  0xf3   :  { %v676_v20 = vmax.f32 %v650_v15, 0.0 }
  0xf5   :  { %v692_v25 = vpack.c.bf16 %v676_v20, %v676_v20  ;;  %1370 = vmatpush.bf16.msrb.mxu2 %v2082_v53  ;;  %1384 = vmatpush.bf16.msrb.mxu3 %v2086_v8  ;;  %v2075_v20 = vld [vmem:[%s3142_s2 + $0x1c8] sm:$0xf0]  ;;  %v2312_v8 = vld [vmem:[%s3143_s3 + $0x70] sm:$0xff] }
  0xf6   :  { %v603_v26 = vpop.f32.mrf.mxu2  ;;  %v507_v38 = vpop.f32.mrf.mxu0  ;;  %v2078_v22 = vor.u32 %v2290_v14, %v2075_v20  ;;  %v2310_v14 = vld [vmem:[%s3143_s3 + $0x60] sm:$0xff]  ;;  %v2309_v20 = vld [vmem:[%s3143_s3 + $0x58] sm:$0xff] }
  0xf7   :  { %v652_v27 = vpop.f32.mrf.mxu3  ;;  %v1055_v34 = vunpack.c.l.b16 %v692_v25  ;;  %v604_v37 = vadd.f32 %v603_v26, %v555_v21  ;;  %v556_v41 = vpop.f32.mrf.mxu1  ;;  %v508_v46 = vadd.f32 %v2742_v51, %v507_v38 }
  0xf9   :  { %v1056_v45 = vpack.c.b16 %v1055_v34, %v1054_v33  ;;  %v653_v49 = vadd.f32 %v652_v27, %v604_v37  ;;  %v557_v55 = vadd.f32 %v556_v41, %v508_v46  ;;  %1371 = vmatpush.bf16.msrb.mxu2 %v2074_v19  ;;  %1385 = vmatpush.bf16.msrb.mxu3 %v2078_v22  ;;  %v2301_v19 = vld [vmem:[%s3143_s3 + $0x18] sm:$0xff]  ;;  %v2308_v22 = vld [vmem:[%s3143_s3 + $0x50] sm:$0xff] }
  0xfb   :  { %2001 = vmatmul.msk.bf16.vlgmr.msra.gmra.mxu0 %vm760_vm0, %v1056_v45  ;;  %2002 = vmatmul.msk.bf16.vlgmr.msra.gmra.mxu1 %vm760_vm0, %v1056_v45  ;;  %v677_v59 = vmax.f32 %v653_v49, 0.0 }
  0xfd   :  { %v693_v5 = vpack.c.bf16 %v677_v59, %v677_v59 }
  0xfe   :  { %v605_v31 = vpop.f32.mrf.mxu2  ;;  %v510_v60 = vpop.f32.mrf.mxu0 }
  0xff   :  { %v654_v40 = vpop.f32.mrf.mxu3  ;;  %v606_v35 = vadd.f32 %v605_v31, %v557_v55  ;;  %v559_v52 = vpop.f32.mrf.mxu1  ;;  %v511_v63 = vadd.f32 %v2742_v51, %v510_v60  ;;  %v1142_v15 = vunpack.c.l.b16 %v693_v5  ;;  %v2305_v5 = vld [vmem:[%s3143_s3 + $0x38] sm:$0xff] }
 0x100   :  { %1543 = vmatpush.bf16.msra.mxu0 %v2305_v5 }
 0x101   :  { %v655_v1 = vadd.f32 %v654_v40, %v606_v35  ;;  %v560_v36 = vadd.f32 %v559_v52, %v511_v63 }
 0x103   :  { %v678_v6 = vmax.f32 %v655_v1, 0.0 }
 0x104   :  { %1544 = vmatpush.bf16.msra.mxu0 %v2304_v7 }
 0x105   :  { %v694_v9 = vpack.c.bf16 %v678_v6, %v678_v6  ;;  %v2313_v6 = vld [vmem:[%s3143_s3 + $0x78] sm:$0xff] }
 0x106   :  { %v608_v10 = vpop.f32.mrf.mxu2  ;;  %v512_v18 = vpop.f32.mrf.mxu0  ;;  %1557 = vmatpush.bf16.msra.mxu1 %v2313_v6 }
 0x107   :  { %v657_v11 = vpop.f32.mrf.mxu3  ;;  %v1143_v16 = vunpack.c.l.b16 %v694_v9  ;;  %v609_v17 = vadd.f32 %v608_v10, %v560_v36  ;;  %v561_v21 = vpop.f32.mrf.mxu1  ;;  %v513_v24 = vadd.f32 %v2742_v51, %v512_v18 }
 0x109   :  { %v1144_v23 = vpack.c.b16 %v1143_v16, %v1142_v15  ;;  %v658_v25 = vadd.f32 %v657_v11, %v609_v17  ;;  %v562_v26 = vadd.f32 %v561_v21, %v513_v24  ;;  %v2303_v11 = vld [vmem:[%s3143_s3 + $0x28] sm:$0xff]  ;;  %v2300_v21 = vld [vmem:[%s3143_s3 + $0x10] sm:$0xff] }
 0x10a   :  { %1558 = vmatpush.bf16.msra.mxu1 %v2312_v8  ;;  %1545 = vmatpush.bf16.msra.mxu0 %v2303_v11 }
 0x10b   :  { %2035 = vmatmul.msk.bf16.vlgmr.msra.gmra.mxu2 %vm760_vm0, %v1144_v23  ;;  %2036 = vmatmul.msk.bf16.vlgmr.msra.gmra.mxu3 %vm760_vm0, %v1144_v23  ;;  %v679_v29 = vmax.f32 %v658_v25, 0.0 }
 0x10d   :  { %v695_v41 = vpack.c.bf16 %v679_v29, %v679_v29  ;;  %v2298_v29 = vld [vmem:[%s3143_s3] sm:$0xff] }
 0x10e   :  { %v610_v27 = vpop.f32.mrf.mxu2  ;;  %v515_v33 = vpop.f32.mrf.mxu0  ;;  %1559 = vmatpush.bf16.msra.mxu1 %v2311_v12  ;;  %1546 = vmatpush.bf16.msra.mxu0 %v2302_v13 }
 0x10f   :  { %v659_v28 = vpop.f32.mrf.mxu3  ;;  %v611_v32 = vadd.f32 %v610_v27, %v562_v26  ;;  %v516_v34 = vadd.f32 %v2742_v51, %v515_v33  ;;  %v564_v38 = vpop.f32.mrf.mxu1  ;;  %v1230_v47 = vunpack.c.l.b16 %v695_v41  ;;  %v2299_v27 = vld [vmem:[%s3143_s3 + $0x8] sm:$0xff] }
 0x111   :  { %v660_v37 = vadd.f32 %v659_v28, %v611_v32  ;;  %v565_v43 = vadd.f32 %v564_v38, %v516_v34  ;;  %v2307_v28 = vld [vmem:[%s3143_s3 + $0x48] sm:$0xff]  ;;  %v2306_v32 = vld [vmem:[%s3143_s3 + $0x40] sm:$0xff] }
 0x112   :  { %1560 = vmatpush.bf16.msra.mxu1 %v2310_v14  ;;  %1547 = vmatpush.bf16.msra.mxu0 %v2301_v19 }
 0x113   :  { %v680_v42 = vmax.f32 %v660_v37, 0.0 }
 0x115   :  { %v696_v44 = vpack.c.bf16 %v680_v42, %v680_v42 }
 0x116   :  { %v613_v45 = vpop.f32.mrf.mxu2  ;;  %v517_v49 = vpop.f32.mrf.mxu0  ;;  %1561 = vmatpush.bf16.msra.mxu1 %v2309_v20  ;;  %1548 = vmatpush.bf16.msra.mxu0 %v2300_v21 }
 0x117   :  { %v662_v46 = vpop.f32.mrf.mxu3  ;;  %v1231_v48 = vunpack.c.l.b16 %v696_v44  ;;  %v614_v30 = vadd.f32 %v613_v45, %v565_v43  ;;  %v518_v50 = vadd.f32 %v2742_v51, %v517_v49  ;;  %v566_v55 = vpop.f32.mrf.mxu1 }
 0x119   :  { %v1232_v39 = vpack.c.b16 %v1231_v48, %v1230_v47  ;;  %v663_v54 = vadd.f32 %v662_v46, %v614_v30  ;;  %v567_v31 = vadd.f32 %v566_v55, %v518_v50 }
 0x11a   :  { %1562 = vmatpush.bf16.msra.mxu1 %v2308_v22  ;;  %1549 = vmatpush.bf16.msra.mxu0 %v2299_v27  ;;  %v2315_v22 = vld [vmem:[%s3140_s4 + $0x2] ss:$0 sm:$0xff] }
 0x11b   :  { %2069 = vmatmul.msk.bf16.vlgmr.msrb.gmra.mxu0 %vm760_vm0, %v1232_v39  ;;  %2070 = vmatmul.msk.bf16.vlgmr.msrb.gmra.mxu1 %vm760_vm0, %v1232_v39  ;;  %v681_v56 = vmax.f32 %v663_v54, 0.0 }
 0x11d   :  { %v697_v35 = vpack.c.bf16 %v681_v56, %v681_v56 }
 0x11e   :  { %v615_v40 = vpop.f32.mrf.mxu2  ;;  %1563 = vmatpush.bf16.msra.mxu1 %v2307_v28  ;;  %1550 = vmatpush.bf16.msra.mxu0 %v2298_v29 }
 0x11f   :  { %v616_v57 = vadd.f32 %v615_v40, %v567_v31  ;;  %v664_v58 = vpop.f32.mrf.mxu3  ;;  %v1318_v61 = vunpack.c.l.b16 %v697_v35 }
 0x121   :  { %v665_v59 = vadd.f32 %v664_v58, %v616_v57 }
 0x122   :  { %1564 = vmatpush.bf16.msra.mxu1 %v2306_v32 }
 0x123   :  { %v682_v60 = vmax.f32 %v665_v59, 0.0 }
 0x125   :  { %v698_v52 = vpack.c.bf16 %v682_v60, %v682_v60 }
 0x127   :  { %v1319_v62 = vunpack.c.l.b16 %v698_v52  ;;  %v2105_v52 = vld [vmem:[%s3140_s4 + $0x1] ss:$4 sm:$0x3] }
 0x129   :  { %v1320_v63 = vpack.c.b16 %v1319_v62, %v1318_v61 }
 0x12b   :  { %2103 = vmatmul.msk.bf16.vlgmr.msrb.gmra.mxu2 %vm760_vm0, %v1320_v63  ;;  %2104 = vmatmul.msk.bf16.vlgmr.msrb.gmra.mxu3 %vm760_vm0, %v1320_v63 }
 0x14e   :  { %v773_v51 = vpop.f32.mrf.mxu2  ;;  %v787_v0 = vpop.f32.mrf.mxu3 }
 0x156   :  { %v775_v1 = vpop.f32.mrf.mxu2  ;;  %v789_v2 = vpop.f32.mrf.mxu3 }
 0x159   :  { %v933_v9 = vpop.f32.mrf.mxu0  ;;  %v947_v10 = vpop.f32.mrf.mxu1 }
 0x15e   :  { %v849_v3 = vpop.f32.mrf.mxu2  ;;  %v863_v4 = vpop.f32.mrf.mxu3 }
 0x15f   :  { %v850_v41 = vadd.f32 %v849_v3, %v773_v51  ;;  %v864_v42 = vadd.f32 %v863_v4, %v787_v0  ;;  %v1400_v3 = vperm.slane %v2105_v52, 1 }
 0x161   :  { %v935_v17 = vpop.f32.mrf.mxu0  ;;  %v949_v18 = vpop.f32.mrf.mxu1  ;;  %v952_v30 = vadd.f32 %v933_v9, %v850_v41  ;;  %v953_v49 = vadd.f32 %v947_v10, %v864_v42 }
 0x166   :  { %v851_v36 = vpop.f32.mrf.mxu2  ;;  %v865_v53 = vpop.f32.mrf.mxu3 }
 0x167   :  { %v852_v47 = vadd.f32 %v851_v36, %v775_v1  ;;  %v866_v48 = vadd.f32 %v865_v53, %v789_v2  ;;  %v1399_v2 = vperm.slane %v2105_v52, 0 }
 0x169   :  { %v954_v54 = vadd.f32 %v935_v17, %v852_v47  ;;  %v955_v55 = vadd.f32 %v949_v18, %v866_v48 }
 0x16e   :  { %v1021_v15 = vpop.f32.mrf.mxu2  ;;  %v1035_v16 = vpop.f32.mrf.mxu3 }
 0x16f   :  { %v1040_v39 = vadd.f32 %v1021_v15, %v952_v30  ;;  %v1041_v50 = vadd.f32 %v1035_v16, %v953_v49 }
 0x176   :  { %v1023_v23 = vpop.f32.mrf.mxu2  ;;  %v1037_v24 = vpop.f32.mrf.mxu3 }
 0x177   :  { %v1042_v58 = vadd.f32 %v1023_v23, %v954_v54  ;;  %v1043_v59 = vadd.f32 %v1037_v24, %v955_v55 }
 0x178   :  { %v1109_v25 = vpop.f32.mrf.mxu0  ;;  %v1123_v26 = vpop.f32.mrf.mxu1 }
 0x179   :  { %v1128_v31 = vadd.f32 %v1109_v25, %v1040_v39  ;;  %v1129_v40 = vadd.f32 %v1123_v26, %v1041_v50 }
 0x180   :  { %v1111_v37 = vpop.f32.mrf.mxu0  ;;  %v1125_v38 = vpop.f32.mrf.mxu1 }
 0x181   :  { %v1130_v61 = vadd.f32 %v1111_v37, %v1042_v58  ;;  %v1131_v62 = vadd.f32 %v1125_v38, %v1043_v59 }
 0x18e   :  { %v1197_v33 = vpop.f32.mrf.mxu2  ;;  %v1211_v34 = vpop.f32.mrf.mxu3 }
 0x18f   :  { %v1216_v35 = vadd.f32 %v1197_v33, %v1128_v31  ;;  %v1217_v60 = vadd.f32 %v1211_v34, %v1129_v40 }
 0x196   :  { %v1199_v43 = vpop.f32.mrf.mxu2  ;;  %v1213_v44 = vpop.f32.mrf.mxu3 }
 0x197   :  { %v1218_v4 = vadd.f32 %v1199_v43, %v1130_v61  ;;  %v1219_v5 = vadd.f32 %v1213_v44, %v1131_v62 }
 0x198   :  { %v1285_v45 = vpop.f32.mrf.mxu0  ;;  %v1299_v46 = vpop.f32.mrf.mxu1 }
 0x199   :  { %v1304_v63 = vadd.f32 %v1285_v45, %v1216_v35  ;;  %v1305_v51 = vadd.f32 %v1299_v46, %v1217_v60 }
 0x1a0   :  { %v1287_v0 = vpop.f32.mrf.mxu0  ;;  %v1301_v1 = vpop.f32.mrf.mxu1 }
 0x1a1   :  { %v1306_v53 = vadd.f32 %v1287_v0, %v1218_v4  ;;  %v1307_v7 = vadd.f32 %v1301_v1, %v1219_v5 }
 0x1ae   :  { %v1373_v56 = vpop.f32.mrf.mxu2  ;;  %v1387_v57 = vpop.f32.mrf.mxu3 }
 0x1af   :  { %v1392_v6 = vadd.f32 %v1373_v56, %v1304_v63  ;;  %v1393_v36 = vadd.f32 %v1387_v57, %v1305_v51 }
 0x1b1   :  { %v1403_v10 = vadd.f32 %v1399_v2, %v1392_v6  ;;  %v1404_v11 = vadd.f32 %v1400_v3, %v1393_v36 }
 0x1b3   :  { %v1407_v16 = vmax.f32 %v1403_v10, 0.0  ;;  %v1408_v17 = vmax.f32 %v1404_v11, 0.0 }
 0x1b6   :  { %v1375_v8 = vpop.f32.mrf.mxu2  ;;  %v1389_v9 = vpop.f32.mrf.mxu3 }
 0x1b7   :  { %v1394_v12 = vadd.f32 %v1375_v8, %v1306_v53  ;;  %v1395_v13 = vadd.f32 %v1389_v9, %v1307_v7 }
 0x1b9   :  { %v1405_v14 = vadd.f32 %v1399_v2, %v1394_v12  ;;  %v1406_v15 = vadd.f32 %v1400_v3, %v1395_v13 }
 0x1bb   :  { %v1409_v18 = vmax.f32 %v1405_v14, 0.0  ;;  %v1410_v19 = vmax.f32 %v1406_v15, 0.0 }
 0x1bd   :  { %v1411_v20 = vpack.c.bf16 %v1409_v18, %v1407_v16  ;;  %v1412_v21 = vpack.c.bf16 %v1410_v19, %v1408_v17 }
 0x1bf   :  { %1551 = vmatmul.bf16.vlgmr.msra.gmra.mxu0 %v1411_v20  ;;  %1565 = vmatmul.bf16.vlgmr.msra.gmra.mxu1 %v1412_v21 }
 0x23c   :  { %v1552_v23 = vpop.f32.mrf.mxu0  ;;  %v1566_v24 = vpop.f32.mrf.mxu1 }
 0x23d   :  { %v1553_v25 = vadd.f32 %v2315_v22, %v1552_v23 }
 0x23f   :  { %v1567_v26 = vadd.f32 %v1566_v24, %v1553_v25 }
 0x241   :  { %1571 = vst [vmem:[%s3144_s5] sm:$0xff] %v1567_v26 }
 0x244   :  { %v1554_v27 = vpop.f32.mrf.mxu0  ;;  %v1568_v29 = vpop.f32.mrf.mxu1 }
 0x245   :  { %v1555_v28 = vadd.f32 %v2315_v22, %v1554_v27 }
 0x247   :  { %v1569_v32 = vadd.f32 %v1568_v29, %v1555_v28 }
 0x249   :  { %1572 = vst [vmem:[%s3144_s5 + $0x8] sm:$0xff] %v1569_v32 }

</bundles_post_ra>
